<compile_context>
chip_gen: v5e
topology: v5e:2x2
jax: 0.10.0
libtpu: 0.0.40
codegen_flags: <defaults>
</compile_context>

<pallas_src>
import jax
import jax.numpy as jnp
from jax import lax
from jax.experimental import pallas as pl
from jax.experimental.pallas import tpu as pltpu


# Explicit scoped-VMEM limit: under v7x's 64 MiB physical VMEM, far above what
# these tiles need (worst case ~21 MiB with the default tiles).
_VMEM_LIMIT_BYTES = 48 * 1024 * 1024
# Keep Z resident in VMEM (single DMA) when it is at most this big; otherwise
# fall back to streaming it per k tile.  Double-buffering means up to 2x this.
_Z_RESIDENT_BUDGET_BYTES = 6 * 1024 * 1024


def _round_up(x, m):
    return ((x + m - 1) // m) * m


def _cdiv(a, b):
    return (a + b - 1) // b


# --------------------------------------------------------------- kernel bodies

def _linear_kernel(x_ref, wt_ref, z_ref):
    # Z tile = X tile @ W^T ; f32 accumulation on the MXU, stored in compute dtype.
    z = jnp.dot(x_ref[...], wt_ref[...], preferred_element_type=jnp.float32)
    z_ref[...] = z.astype(z_ref.dtype)


def _make_spmm_stats_kernel(*, N, tm, tk, num_k, compute_dtype,
                            z_resident, mask_cols, mask_rows):
    """H = A @ Z with f32 accumulation + streamed global BatchNorm statistics."""

    def kernel(a_ref, z_ref, h_ref, psum_ref, psq_ref, acc_ref):
        i = pl.program_id(0)
        k = pl.program_id(1)

        @pl.when(k == 0)
        def _():
            acc_ref[...] = jnp.zeros_like(acc_ref)

        if z_resident:
            # Z lives fully in VMEM (block index constant across the grid):
            # slice the current k window in-kernel.
            z = z_ref[pl.ds(pl.multiple_of(k * tk, 128), tk), :]
        else:
            z = z_ref[...]

        def accum(a_tile):
            acc_ref[...] += jnp.dot(a_tile, z,
                                    preferred_element_type=jnp.float32)

        a = a_ref[...].astype(compute_dtype)

        if mask_cols:
            # Only the last k tile straddles A's true column extent; its OOB
            # columns are stale VMEM (possibly NaN), so zero them there only.
            @pl.when(k == num_k - 1)
            def _():
                col = k * tk + lax.broadcasted_iota(jnp.int32, a.shape, 1)
                accum(jnp.where(col < N, a, jnp.zeros_like(a)))

            @pl.when(k < num_k - 1)
            def _():
                accum(a)
        else:
            accum(a)

        @pl.when(k == num_k - 1)
        def _():
            h = acc_ref[...]
            h_ref[...] = h.astype(h_ref.dtype)
            # Streaming BatchNorm statistics (per-row-tile column sum / sum of
            # squares).  Rows beyond N (only present in the last partial row
            # tile) are excluded so the later global reduction is exact.
            hs = h
            if mask_rows:
                row = i * tm + lax.broadcasted_iota(jnp.int32, h.shape, 0)
                hs = jnp.where(row < N, h, jnp.zeros_like(h))
            s = jnp.sum(hs, axis=0, keepdims=True)           # (1, out_pad)
            sq = jnp.sum(hs * hs, axis=0, keepdims=True)     # (1, out_pad)
            psum_ref[...] = jnp.broadcast_to(s[:, None, :], psum_ref.shape)
            psq_ref[...] = jnp.broadcast_to(sq[:, None, :], psq_ref.shape)

    return kernel


def _make_bn_relu_kernel(out_dim):
    def kernel(h_ref, scale_ref, shift_ref, o_ref):
        h = h_ref[...].astype(jnp.float32)
        y = jnp.maximum(h * scale_ref[...] + shift_ref[...], 0.0)
        # Write the true (narrow) output directly; masked stores are cheap at
        # small out_dim and avoid an extra XLA slice copy.
        o_ref[...] = y[:, :out_dim].astype(o_ref.dtype)
    return kernel


# -------------------------------------------------------------------- wrapper

def graph_convolution(X, A, W, gamma, beta, *, eps=1e-5,
                      compute_dtype=jnp.bfloat16, tm=512, tk=2048):
    """Pallas GraphConvolution forward.

    X:     [N, in_dim]        node features
    A:     [N, N]             dense adjacency (consumed directly, any float dtype)
    W:     [out_dim, in_dim]  nn.Linear weight (PyTorch layout)
    gamma: [out_dim]          BatchNorm1d weight
    beta:  [out_dim]          BatchNorm1d bias
    returns [N, out_dim] float32
    """
    N, in_dim = X.shape
    out_dim = W.shape[0]
    f32 = jnp.float32

    # ---- tiling (lane-dense out_pad, bf16-friendly sublane tiles) ----------
    out_pad = _round_up(out_dim, 128)

    # Row tile: multiple of 16 (bf16 packs two rows per sublane); keep >= 2 row
    # tiles when N allows so both v7x TensorCores get work on the parallel axis.
    tm = max(16, min(tm, _round_up(N, 16)))
    tm = _round_up(tm, 16)
    if N > 32 and _cdiv(N, tm) < 2:
        tm = _round_up(_cdiv(N, 2), 16)
    num_i = _cdiv(N, tm)

    # A-column / Z-row tile: multiple of 128 (lane dim of the A tile).
    tk = max(128, min(tk, _round_up(N, 128)))
    tk = _round_up(tk, 128)
    num_k = _cdiv(N, tk)
    n_pad_k = num_k * tk

    a_itemsize = jnp.dtype(A.dtype).itemsize
    c_itemsize = jnp.dtype(compute_dtype).itemsize

    # Cheap pads only (N x in_dim, in_dim x out_pad).  The dominant N x N
    # adjacency A is NOT copied, padded or recast in the wrapper.
    Xp = jnp.zeros((n_pad_k, in_dim), compute_dtype).at[:N, :].set(
        X.astype(compute_dtype))
    Wt = jnp.zeros((in_dim, out_pad), compute_dtype).at[:, :out_dim].set(
        jnp.transpose(W).astype(compute_dtype))
    gamma_p = jnp.zeros((out_pad,), f32).at[:out_dim].set(gamma.astype(f32))
    beta_p = jnp.zeros((out_pad,), f32).at[:out_dim].set(beta.astype(f32))

    # ---- kernel 1: Z = X @ W^T (hoisted, computed exactly once) ------------
    # Zero-padded X rows give exactly-zero padded Z rows (NaN-safe for the
    # partial k tiles of kernel 2).
    Z = pl.pallas_call(
        _linear_kernel,
        out_shape=jax.ShapeDtypeStruct((n_pad_k, out_pad), compute_dtype),
        grid=(num_k,),
        in_specs=[
            pl.BlockSpec((tk, in_dim), lambda i: (i, 0)),
            pl.BlockSpec((in_dim, out_pad), lambda i: (0, 0)),
        ],
        out_specs=pl.BlockSpec((tk, out_pad), lambda i: (i, 0)),
        compiler_params=pltpu.CompilerParams(
            dimension_semantics=("parallel",),
            vmem_limit_bytes=_VMEM_LIMIT_BYTES),
        cost_estimate=pl.CostEstimate(
            flops=2 * n_pad_k * in_dim * out_pad,
            transcendentals=0,
            bytes_accessed=(Xp.size * c_itemsize + Wt.size * c_itemsize
                            + n_pad_k * out_pad * c_itemsize)),
    )(Xp, Wt)

    # ---- kernel 2: H = A @ Z + streaming BN partial stats ------------------
    z_resident = (n_pad_k * out_pad * c_itemsize) <= _Z_RESIDENT_BUDGET_BYTES
    mask_cols = (N % tk) != 0
    mask_rows = (N % tm) != 0

    if z_resident:
        # Constant block index across the whole grid -> DMA'd once, resident.
        z_spec = pl.BlockSpec((n_pad_k, out_pad), lambda i, k: (0, 0))
    else:
        z_spec = pl.BlockSpec((tk, out_pad), lambda i, k: (k, 0))

    spmm_kernel = _make_spmm_stats_kernel(
        N=N, tm=tm, tk=tk, num_k=num_k, compute_dtype=compute_dtype,
        z_resident=z_resident, mask_cols=mask_cols, mask_rows=mask_rows)

    H, psum, psq = pl.pallas_call(
        spmm_kernel,
        out_shape=(
            jax.ShapeDtypeStruct((N, out_pad), compute_dtype),   # H in bf16
            jax.ShapeDtypeStruct((num_i, 8, out_pad), f32),      # col sums
            jax.ShapeDtypeStruct((num_i, 8, out_pad), f32),      # col sums of sq
        ),
        grid=(num_i, num_k),
        in_specs=[
            pl.BlockSpec((tm, tk), lambda i, k: (i, k)),   # A, straight from HBM
            z_spec,
        ],
        out_specs=(
            pl.BlockSpec((tm, out_pad), lambda i, k: (i, 0)),
            pl.BlockSpec((1, 8, out_pad), lambda i, k: (i, 0, 0)),
            pl.BlockSpec((1, 8, out_pad), lambda i, k: (i, 0, 0)),
        ),
        scratch_shapes=[pltpu.VMEM((tm, out_pad), f32)],   # f32 accumulator
        compiler_params=pltpu.CompilerParams(
            dimension_semantics=("parallel", "arbitrary"),
            vmem_limit_bytes=_VMEM_LIMIT_BYTES),
        cost_estimate=pl.CostEstimate(
            flops=2 * num_i * tm * n_pad_k * out_pad,
            transcendentals=0,
            bytes_accessed=(N * N * a_itemsize
                            + n_pad_k * out_pad * c_itemsize
                            + N * out_pad * c_itemsize)),
    )(A, Z)

    # ---- tiny finalize: global BN stats -> folded scale/shift --------------
    # NOTE: E[x^2]-E[x]^2 in f32; adequate here (H columns are ~zero-mean), but
    # could be switched to a two-pass variance if BN drifts for huge N.
    col_sum = jnp.sum(psum[:, 0, :], axis=0)             # (out_pad,)
    col_sq = jnp.sum(psq[:, 0, :], axis=0)
    inv_n = 1.0 / jnp.float32(N)
    mean = col_sum * inv_n
    var = jnp.maximum(col_sq * inv_n - mean * mean, 0.0)  # biased training var
    rstd = lax.rsqrt(var + eps)
    scale = (gamma_p * rstd).reshape(1, out_pad)
    shift = (beta_p - mean * gamma_p * rstd).reshape(1, out_pad)

    # ---- kernel 3: out = relu(H * scale + shift), narrow output ------------
    out = pl.pallas_call(
        _make_bn_relu_kernel(out_dim),
        out_shape=jax.ShapeDtypeStruct((N, out_dim), f32),
        grid=(num_i,),
        in_specs=[
            pl.BlockSpec((tm, out_pad), lambda i: (i, 0)),
            pl.BlockSpec((1, out_pad), lambda i: (0, 0)),
            pl.BlockSpec((1, out_pad), lambda i: (0, 0)),
        ],
        out_specs=pl.BlockSpec((tm, out_dim), lambda i: (i, 0)),
        compiler_params=pltpu.CompilerParams(
            dimension_semantics=("parallel",),
            vmem_limit_bytes=_VMEM_LIMIT_BYTES),
    )(H, scale, shift)

    return out


# ------------------------------------------------------------------ references

def _reference_f32(X, A, W, gamma, beta, eps=1e-5):
    Z = X @ W.T
    H = A @ Z
    mean = H.mean(axis=0, keepdims=True)
    var = ((H - mean) ** 2).mean(axis=0, keepdims=True)
    Hn = (H - mean) / jnp.sqrt(var + eps)
    return jnp.maximum(Hn * gamma[None, :] + beta[None, :], 0.0)


def _reference_matched(X, A, W, gamma, beta, eps=1e-5,
                       compute_dtype=jnp.bfloat16):
    # Same numerics policy as the kernels: bf16 operands, f32 accumulation,
    # bf16 H re-read, E[x^2]-E[x]^2 variance, rsqrt.
    Xc = X.astype(compute_dtype)
    Wt = jnp.transpose(W).astype(compute_dtype)
    Ac = A.astype(compute_dtype)
    Z = jnp.dot(Xc, Wt, preferred_element_type=jnp.float32).astype(compute_dtype)
    H = jnp.dot(Ac, Z, preferred_element_type=jnp.float32)
    n = jnp.float32(H.shape[0])
    mean = jnp.sum(H, axis=0) / n
    var = jnp.maximum(jnp.sum(H * H, axis=0) / n - mean * mean, 0.0)
    rstd = lax.rsqrt(var + eps)
    Hb = H.astype(compute_dtype).astype(jnp.float32)
    return jnp.maximum(Hb * (rstd * gamma)[None, :]
                       + (beta - mean * rstd * gamma)[None, :], 0.0)


if __name__ == "__main__":
    # Small shapes consistent with the module: N nodes, in_dim -> out_dim.
    # N=500 deliberately does NOT divide the tiles, so this exercises partial
    # edge tiles (column/row masking), the k-reduction accumulator, the
    # resident-Z path and the streamed-BN partial-stat reduction.
    N, in_dim, out_dim = 500, 64, 8
    tm, tk = 128, 256

    key = jax.random.PRNGKey(0)
    kx, ka, kw = jax.random.split(key, 3)

    X = jax.random.normal(kx, (N, in_dim), dtype=jnp.float32)
    A_raw = jax.random.uniform(ka, (N, N), dtype=jnp.float32)
    A = 0.5 * (A_raw + A_raw.T)                       # symmetric dense adjacency

    bound = 1.0 / jnp.sqrt(jnp.float32(in_dim))       # nn.Linear-style init
    W = jax.random.uniform(kw, (out_dim, in_dim), dtype=jnp.float32,
                           minval=-bound, maxval=bound)
    gamma = jnp.ones((out_dim,), dtype=jnp.float32)   # BatchNorm1d weight init
    beta = jnp.zeros((out_dim,), dtype=jnp.float32)   # BatchNorm1d bias init

    out = graph_convolution(X, A, W, gamma, beta, tm=tm, tk=tk)
    out = jax.block_until_ready(out)

    assert out.shape == (N, out_dim)
    assert bool(jnp.all(jnp.isfinite(out))), "non-finite values in output"

    ref_m = _reference_matched(X, A, W, gamma, beta)
    ref_f = _reference_f32(X, A, W, gamma, beta)
    assert jnp.allclose(out, ref_m, atol=2e-3, rtol=2e-3), \
        "mismatch vs matched-precision reference"
    assert jnp.allclose(out, ref_f, atol=5e-2, rtol=5e-2), \
        "mismatch vs float32 reference"

    print("KERNEL_OK")
</pallas_src>

<mosaic_0001>
module attributes {stable_mosaic.version = 11 : i64} {
  func.func @_linear_kernel(%arg0: i32, %arg1: memref<256x64xbf16, #tpu.memory_space<vmem>>, %arg2: memref<64x128xbf16, #tpu.memory_space<vmem>>, %arg3: memref<256x128xbf16, #tpu.memory_space<vmem>>) attributes {dimension_semantics = [#tpu.dimension_semantics<parallel>], iteration_bounds = array<i64: 2>, scalar_prefetch = 0 : i64, scratch_operands = 0 : i64, tpu.core_type = #tpu.core_type<tc>, window_params = [{transform_indices = @transform_0, window_bounds = array<i64: 256, 64>}, {pipeline_mode = #tpu.pipeline_mode<synchronous>, transform_indices = @transform_1, window_bounds = array<i64: 64, 128>}, {transform_indices = @transform_2, window_bounds = array<i64: 256, 128>}]} {
    %c0 = arith.constant 0 : index
    %c0_0 = arith.constant 0 : index
    %0 = vector.load %arg1[%c0, %c0_0] : memref<256x64xbf16, #tpu.memory_space<vmem>>, vector<256x64xbf16>
    %c0_1 = arith.constant 0 : index
    %c0_2 = arith.constant 0 : index
    %1 = vector.load %arg2[%c0_1, %c0_2] : memref<64x128xbf16, #tpu.memory_space<vmem>>, vector<64x128xbf16>
    %cst = arith.constant dense<0.000000e+00> : vector<256x128xf32>
    %2 = tpu.matmul %0, %1, %cst {dimension_numbers = #tpu.dot_dimension_numbers<[1], [0], [0], [1], [0, 0, 1, 1], [], []>} : vector<256x64xbf16>, vector<64x128xbf16>, vector<256x128xf32> -> vector<256x128xf32>
    %3 = arith.truncf %2 : vector<256x128xf32> to vector<256x128xbf16>
    %c0_3 = arith.constant 0 : index
    %c0_4 = arith.constant 0 : index
    %4 = vector.load %arg3[%c0_3, %c0_4] : memref<256x128xbf16, #tpu.memory_space<vmem>>, vector<256x128xbf16>
    tpu.vector_store %arg3[%c0_3, %c0_4], %3 {strides = array<i32>} : memref<256x128xbf16, #tpu.memory_space<vmem>>, vector<256x128xbf16>,
    return
  }
  func.func @transform_0(%arg0: i32) -> (i32, i32) {
    %c0_i32 = arith.constant 0 : i32
    %c0_i32_0 = arith.constant 0 : i32
    return %arg0, %c0_i32 : i32, i32
  }
  func.func @transform_1(%arg0: i32) -> (i32, i32) {
    %c0_i32 = arith.constant 0 : i32
    %c0_i32_0 = arith.constant 0 : i32
    %c0_i32_1 = arith.constant 0 : i32
    return %c0_i32, %c0_i32_0 : i32, i32
  }
  func.func @transform_2(%arg0: i32) -> (i32, i32) {
    %c0_i32 = arith.constant 0 : i32
    %c0_i32_0 = arith.constant 0 : i32
    return %arg0, %c0_i32 : i32, i32
  }
}

</mosaic_0001>

<bundles_post_ra>
// kernel: tpu_custom_call.1
= control target key start
LH: loop header
LB: loop body
LE: loop exit
PB: predicated region body
PF: predicated region fallthrough
CT: control target
= control target key end

     0   :  { %7 = vsyncpa [#allocation3], 0  ;;  %s1081_s0 = inlined_call_operand.vmem [shape: bf16[512,64], index: 0, kind: input, shape index: {}]   ;;  %s1082_s1 = inlined_call_operand.vmem [shape: bf16[64,128], index: 1, kind: input, shape index: {}]   ;;  %s1083_s2 = inlined_call_operand.hbm [shape: bf16[512,128], index: 2, kind: output, shape index: {}]  }
   0x1   :  { %9 = vsyncpa [#allocation3 + $0x1], 0  ;;  %s928_s9 = smov 0   ;;  %s930_s10 = smov 0  }
   0x2   :  { %s932_s11 = smov 0   ;;  %s934_s12 = smov 0  }
   0x3 LB: > { %s949_s13 = sadd.s32 4294967295, %s909_s12   ;;  %s570_s14 = sadd.s32 4294967294, %s909_s12   ;;  %s909_s12 = sphi %s934_s12, %s1089_s12   ;;  %s905_s11 = sphi %s932_s11, %s1088_s11   ;;  %s901_s10 = sphi %s930_s10, %s1087_s10   ;;  %s897_s9 = sphi %s928_s9, %s1086_s9  }
   0x4   : > { %s953_s15 = sadd.s32 1, %s909_s12   ;;  %s69_s16 = sadd.s32 1, %s905_s11 }
   0x5   : > { %s66_s17 = ssub.s32 %s909_s12, %s953_s15  ;;  %p79_p0 = scmp.ne.s32.totalorder %s905_s11, %s901_s10 }
   0x6   : > { %p67_p1 = scmp.eq.s32.totalorder %s66_s17, 0  ;;  %p80_p2 = scmp.eq.s32.totalorder %s949_s13, 1 }
   0x7   : > { %p85_p3 = scmp.ne.s32.totalorder %s901_s10, %s897_s9  ;;  %p86_p4 = scmp.eq.s32.totalorder %s570_s14, 1 }
   0x8   : > { %s964_s18 = scalar_select %p67_p1, %s905_s11, %s69_s16  }
   0x9   : > { %p966_p5 = por %p80_p2, %p79_p0  ;;  %p970_p6 = por %p86_p4, %p85_p3 }
   0xa   : > { %p573_p7 = scmp.ge.s32.totalorder %s909_s12, 1  ;;  %p116_p8 = scmp.lt.s32.totalorder %s909_s12, 3 }
   0xc   : > { %p117_p9 = pnand %p573_p7, %p116_p8 }
   0xd   : > { %s575_s23 = sshll.u32 (!%p117_p9), %s949_s13, 5  ;;  %s135_s6 = sand.u32 (!%p117_p9), 1, %s901_s10  }
   0xe   : > { %120 = sbr.rel (%p117_p9) target bundleno = 231 (0xe7), region = 28  ;;  %p139_p10 = scmp.lt.s32.totalorder (!%p117_p9), %s575_s23, 63 }
   0xf   : > { %s574_s7 = sshll.u32 (!%p117_p9), %s135_s6, 7  ;;  %s698_s14 = sshll.u32 (!%p117_p9), %s949_s13, 7 }
  0x10   : > { %s1029_s8 = scalar_lea.vmem (!%p117_p9), [#allocation2], %s574_s7  ;;  %s504_s21 = scalar_lea.hbm (!%p117_p9), %s1083_s2, %s698_s14 }
  0x11   : > { %s505_s22 = sshll.u32 (!%p117_p9), %s1029_s8, 4  ;;  %s493_s13 = scalar_lea.sflag (!%p117_p9), [#allocation3], %s135_s6  ;;  %s506_s22 = int_to_ptr.vmem [resolvable:$true] %s505_s22 }
  0x13   : > { %v697_v0 = vld [vmem:[%s1082_s1 + $0x18] sm:$0xff]  ;;  %v696_v1 = vld [vmem:[%s1082_s1 + $0x10] sm:$0xff]  ;;  %s1091_s23 = smov (!%p139_p10, %s575_s23), 63  ;;  %v695_v2 = vld [vmem:[%s1082_s1 + $0x8] sm:$0xff]  ;;  %vm290_vm0 = vcmask 523264  }
  0x14   : > { %343 = vmatpush.bf16.msra.mxu0 %v697_v0  ;;  %794 = vmatpush.bf16.msra.mxu1 %v697_v0  ;;  %s576_s28 = sshll.u32 %s1091_s23, 2  ;;  %v694_v3 = vld [vmem:[%s1082_s1] sm:$0xff]  ;;  %s507_s23 = sshll.u32 %s504_s21, 4  ;;  %s508_s23 = int_to_ptr.hbm [resolvable:$true] %s507_s23 }
  0x15   : > { %795 = vmatpush.bf16.msra.mxu2 %v697_v0  ;;  %796 = vmatpush.bf16.msra.mxu3 %v697_v0  ;;  %s992_s5 = scalar_lea.vmem %s1081_s0, %s576_s28  ;;  %s861_s24 = sshra.s32 %s508_s23, 4  ;;  %s862_s24 = int_to_ptr.hbm [resolvable:$true] %s861_s24 }
  0x16   : > { %v678_v4 = vld [vmem:[%s992_s5] sm:$0xff]  ;;  %v679_v8 = vld [vmem:[%s992_s5 + $0x8] sm:$0xff]  ;;  %v680_v12 = vld [vmem:[%s992_s5 + $0x10] sm:$0xff]  ;;  %s863_s25 = scalar_lea.hbm %s862_s24, 128  ;;  %s867_s28 = scalar_lea.hbm %s1083_s2, 256 }
  0x17   : > { %v682_v5 = vld [vmem:[%s992_s5 + $0x20] sm:$0xff]  ;;  %v683_v9 = vld [vmem:[%s992_s5 + $0x28] sm:$0xff]  ;;  %v684_v13 = vld [vmem:[%s992_s5 + $0x30] sm:$0xff]  ;;  %p864_p11 = scmp.ne.s32.totalorder %s862_s24, %s863_s25  ;;  %p868_p0 = scmp.lt.s32.totalorder %s862_s24, %s1083_s2 }
  0x18   : > { %344 = vmatpush.bf16.msra.mxu0 %v696_v1  ;;  %797 = vmatpush.bf16.msra.mxu1 %v696_v1  ;;  %v686_v6 = vld [vmem:[%s992_s5 + $0x40] sm:$0xff]  ;;  %v687_v10 = vld [vmem:[%s992_s5 + $0x48] sm:$0xff]  ;;  %v688_v14 = vld [vmem:[%s992_s5 + $0x50] sm:$0xff]  ;;  %p869_p1 = scmp.lt.s32.totalorder %s867_s28, %s863_s25 }
  0x19   : > { %798 = vmatpush.bf16.msra.mxu2 %v696_v1  ;;  %799 = vmatpush.bf16.msra.mxu3 %v696_v1  ;;  %v690_v7 = vld [vmem:[%s992_s5 + $0x60] sm:$0xff]  ;;  %v691_v11 = vld [vmem:[%s992_s5 + $0x68] sm:$0xff]  ;;  %v692_v15 = vld [vmem:[%s992_s5 + $0x70] sm:$0xff]  ;;  %p865_p12 = pnand %p864_p11, %p966_p5 }
  0x1a   : > { %v681_v16 = vld [vmem:[%s992_s5 + $0x18] sm:$0xff]  ;;  %p870_p2 = por %p869_p1, %p868_p0 }
  0x1b   : > { %v685_v17 = vld [vmem:[%s992_s5 + $0x38] sm:$0xff]  ;;  %p866_p13 = pneg %p865_p12 }
  0x1c   : > { %345 = vmatpush.bf16.msra.mxu0 %v695_v2  ;;  %800 = vmatpush.bf16.msra.mxu1 %v695_v2  ;;  %v689_v18 = vld [vmem:[%s992_s5 + $0x58] sm:$0xff] }
  0x1d   : > { %801 = vmatpush.bf16.msra.mxu2 %v695_v2  ;;  %802 = vmatpush.bf16.msra.mxu3 %v695_v2  ;;  %v693_v19 = vld [vmem:[%s992_s5 + $0x78] sm:$0xff]  ;;  %p871_p3 = pnand %p870_p2, %p866_p13 }
  0x20   : > { %346 = vmatpush.bf16.msra.mxu0 %v694_v3  ;;  %803 = vmatpush.bf16.msra.mxu1 %v694_v3 }
  0x21   : > { %804 = vmatpush.bf16.msra.mxu2 %v694_v3  ;;  %805 = vmatpush.bf16.msra.mxu3 %v694_v3 }
  0x23   : > { %657 = vmatmul.msk.bf16.vlgmr.msra.gmra.mxu0 %vm290_vm0, %v678_v4  ;;  %661 = vmatmul.msk.bf16.vlgmr.msra.gmra.mxu1 %vm290_vm0, %v682_v5 }
  0x24   : > { %665 = vmatmul.msk.bf16.vlgmr.msra.gmra.mxu2 %vm290_vm0, %v686_v6  ;;  %669 = vmatmul.msk.bf16.vlgmr.msra.gmra.mxu3 %vm290_vm0, %v690_v7 }
  0x33   : > { %658 = vmatmul.msk.bf16.gmra.mxu0 %vm290_vm0, %v679_v8  ;;  %662 = vmatmul.msk.bf16.gmra.mxu1 %vm290_vm0, %v683_v9 }
  0x34   : > { %666 = vmatmul.msk.bf16.gmra.mxu2 %vm290_vm0, %v687_v10  ;;  %670 = vmatmul.msk.bf16.gmra.mxu3 %vm290_vm0, %v691_v11 }
  0x43   : > { %659 = vmatmul.msk.bf16.gmra.mxu0 %vm290_vm0, %v680_v12  ;;  %663 = vmatmul.msk.bf16.gmra.mxu1 %vm290_vm0, %v684_v13 }
  0x44   : > { %667 = vmatmul.msk.bf16.gmra.mxu2 %vm290_vm0, %v688_v14  ;;  %671 = vmatmul.msk.bf16.gmra.mxu3 %vm290_vm0, %v692_v15 }
  0x53   : > { %660 = vmatmul.msk.bf16.gmra.mxu0 %vm290_vm0, %v681_v16  ;;  %664 = vmatmul.msk.bf16.gmra.mxu1 %vm290_vm0, %v685_v17 }
  0x54   : > { %668 = vmatmul.msk.bf16.gmra.mxu2 %vm290_vm0, %v689_v18  ;;  %672 = vmatmul.msk.bf16.gmra.mxu3 %vm290_vm0, %v693_v19 }
  0xa0   : > { %v348_v20 = vpop.f32.mrf.mxu0  ;;  %v368_v21 = vpop.f32.mrf.mxu1 }
  0xa7   : > { %v388_v22 = vpop.f32.mrf.mxu2  ;;  %v408_v23 = vpop.f32.mrf.mxu3 }
  0xa8   : > { %v350_v24 = vpop.f32.mrf.mxu0  ;;  %v370_v25 = vpop.f32.mrf.mxu1 }
  0xa9   : > { %v702_v26 = vpack.c.bf16 %v350_v24, %v348_v20  ;;  %v722_v27 = vpack.c.bf16 %v370_v25, %v368_v21 }
  0xab   : > { %703 = vst [vmem:[%s1029_s8] sm:$0xff] %v702_v26  }
  0xac   : > { %782 = vst [vmem:[%s1029_s8 + $0x20] sm:$0xff] %v722_v27  }
  0xaf   : > { %v390_v28 = vpop.f32.mrf.mxu2  ;;  %v410_v29 = vpop.f32.mrf.mxu3 }
  0xb0   : > { %v742_v30 = vpack.c.bf16 %v390_v28, %v388_v22  ;;  %v762_v31 = vpack.c.bf16 %v410_v29, %v408_v23  ;;  %v353_v32 = vpop.f32.mrf.mxu0  ;;  %v373_v33 = vpop.f32.mrf.mxu1 }
  0xb2   : > { %786 = vst [vmem:[%s1029_s8 + $0x40] sm:$0xff] %v742_v30  }
  0xb3   : > { %790 = vst [vmem:[%s1029_s8 + $0x60] sm:$0xff] %v762_v31  }
  0xb7   : > { %v393_v34 = vpop.f32.mrf.mxu2  ;;  %v413_v35 = vpop.f32.mrf.mxu3 }
  0xb8   : > { %v355_v36 = vpop.f32.mrf.mxu0  ;;  %v375_v37 = vpop.f32.mrf.mxu1 }
  0xb9   : > { %v707_v38 = vpack.c.bf16 %v355_v36, %v353_v32  ;;  %v727_v39 = vpack.c.bf16 %v375_v37, %v373_v33 }
  0xbb   : > { %779 = vst [vmem:[%s1029_s8 + $0x8] sm:$0xff] %v707_v38  }
  0xbc   : > { %783 = vst [vmem:[%s1029_s8 + $0x28] sm:$0xff] %v727_v39  }
  0xbf   : > { %v395_v40 = vpop.f32.mrf.mxu2  ;;  %v415_v41 = vpop.f32.mrf.mxu3 }
  0xc0   : > { %v747_v42 = vpack.c.bf16 %v395_v40, %v393_v34  ;;  %v767_v43 = vpack.c.bf16 %v415_v41, %v413_v35  ;;  %v358_v44 = vpop.f32.mrf.mxu0  ;;  %v378_v45 = vpop.f32.mrf.mxu1 }
  0xc2   : > { %787 = vst [vmem:[%s1029_s8 + $0x48] sm:$0xff] %v747_v42  }
  0xc3   : > { %791 = vst [vmem:[%s1029_s8 + $0x68] sm:$0xff] %v767_v43  }
  0xc7   : > { %v398_v46 = vpop.f32.mrf.mxu2  ;;  %v418_v47 = vpop.f32.mrf.mxu3 }
  0xc8   : > { %v360_v48 = vpop.f32.mrf.mxu0  ;;  %v380_v49 = vpop.f32.mrf.mxu1 }
  0xc9   : > { %v712_v50 = vpack.c.bf16 %v360_v48, %v358_v44  ;;  %v732_v51 = vpack.c.bf16 %v380_v49, %v378_v45 }
  0xcb   : > { %780 = vst [vmem:[%s1029_s8 + $0x10] sm:$0xff] %v712_v50  }
  0xcc   : > { %784 = vst [vmem:[%s1029_s8 + $0x30] sm:$0xff] %v732_v51  }
  0xcf   : > { %v400_v52 = vpop.f32.mrf.mxu2  ;;  %v420_v53 = vpop.f32.mrf.mxu3 }
  0xd0   : > { %v752_v54 = vpack.c.bf16 %v400_v52, %v398_v46  ;;  %v772_v55 = vpack.c.bf16 %v420_v53, %v418_v47  ;;  %v363_v56 = vpop.f32.mrf.mxu0  ;;  %v383_v57 = vpop.f32.mrf.mxu1 }
  0xd2   : > { %788 = vst [vmem:[%s1029_s8 + $0x50] sm:$0xff] %v752_v54  }
  0xd3   : > { %792 = vst [vmem:[%s1029_s8 + $0x70] sm:$0xff] %v772_v55  }
  0xd7   : > { %v403_v58 = vpop.f32.mrf.mxu2  ;;  %v423_v59 = vpop.f32.mrf.mxu3 }
  0xd8   : > { %v365_v60 = vpop.f32.mrf.mxu0  ;;  %v385_v61 = vpop.f32.mrf.mxu1 }
  0xd9   : > { %v717_v62 = vpack.c.bf16 %v365_v60, %v363_v56  ;;  %v737_v63 = vpack.c.bf16 %v385_v61, %v383_v57 }
  0xdb   : > { %781 = vst [vmem:[%s1029_s8 + $0x18] sm:$0xff] %v717_v62  }
  0xdc   : > { %785 = vst [vmem:[%s1029_s8 + $0x38] sm:$0xff] %v737_v63  }
  0xdf   : > { %v405_v0 = vpop.f32.mrf.mxu2  ;;  %v425_v1 = vpop.f32.mrf.mxu3 }
  0xe0   : > { %v757_v2 = vpack.c.bf16 %v405_v0, %v403_v58  ;;  %v777_v3 = vpack.c.bf16 %v425_v1, %v423_v59 }
  0xe2   : > { %789 = vst [vmem:[%s1029_s8 + $0x58] sm:$0xff] %v757_v2  }
  0xe3   : > { %793 = vst [vmem:[%s1029_s8 + $0x78] sm:$0xff] %v777_v3  }
  0xe4   : > { %874 = shalt.err (!%p871_p3)
}
  0xe5   : > { %s911_s3 = smov 64   ;;  %s912_s4 = smov 4  }
  0xe6   : > { %806 = dma.vmem_to_hbm [thread:$0]  (%p966_p5), %s506_s22, 2048, %s508_s23, %s493_s13, %s911_s3, %s911_s3, %s912_s4  }
  0xe7 PF: > { %p812_p4 = scmp.ge.s32.totalorder %s909_s12, 2  ;;  %s522_s5 = sand.u32 1, %s897_s9  }
  0xe8   : > { %s523_s6 = scalar_lea.sflag [#allocation3], %s522_s5 }
  0xe9   : > { %p809_p7 = pnand %p812_p4, %p970_p6 }
  0xeb   : > { %p810_p8 = pneg %p809_p7 }
  0xed   : > { %892 = dma.done.wait (%p810_p8), %s523_s6, 2048  }
  0xee   : > { %894 = vsyncadd (%p810_p8), %s523_s6, 4294965248  ;;  %p12_p9 = scmp.ge.s32.totalorder %s953_s15, 4   ;;  %s1086_s9 = smov %s901_s10 }
  0xef   : > { %s1087_s10 = smov %s905_s11  ;;  %s1088_s11 = smov %s964_s18 }
  0xf0   : > { %s1089_s12 = smov %s953_s15  ;;  %14 = sbr.rel (!%p12_p9) target bundleno = 3 (0x3), region = 63 }
  0xf5   :  { %529 = vsyncpa [#allocation3], 1 }
  0xf6   :  { %531 = vsyncpa [#allocation3 + $0x1], 1 }

</bundles_post_ra>
